<compile_context>
chip_gen: v7x
topology: tpu7x:2x2x1
jax: 0.10.0
libtpu: 0.0.40
codegen_flags: <defaults>
</compile_context>

<pallas_src>
import jax
import jax.numpy as jnp
from jax.experimental import pallas as pl
from jax.experimental.pallas import tpu as pltpu

_LANE = 128      # lane width: last-dim padding target
_SUBLANE = 8     # sublane width: second-to-last-dim padding target


def _pad_axis(a, axis, mult):
    pad = (-a.shape[axis]) % mult
    if pad == 0:
        return a
    widths = [(0, 0)] * a.ndim
    widths[axis] = (0, pad)
    return jnp.pad(a, widths)


def _mean_mlp_kernel(x_ref, w1_ref, b1_ref, w2_ref, b2_ref, o_ref):
    S, B, D = x_ref.shape
    H = w1_ref.shape[1]
    inv_s = jnp.float32(1.0 / S)  # precomputed reciprocal; no divide in-kernel

    # One big first-layer matmul over all S*B rows.  Merging the leading dims
    # is layout-safe: B is a multiple of 8 (sublane) and D of 128 (lane).
    x2 = x_ref[...].reshape(S * B, D)
    h = jnp.dot(x2, w1_ref[...], preferred_element_type=jnp.float32) + b1_ref[...]
    h = jnp.maximum(h, 0.0)

    # Mean over the sample dim BEFORE the second Linear (mean commutes with
    # the affine map), so layer 2 and the b2 add run exactly once.
    hm = h.reshape(S, B, H).sum(axis=0) * inv_s

    o = jnp.dot(hm, w2_ref[...], preferred_element_type=jnp.float32) + b2_ref[...]
    o_ref[...] = o.astype(o_ref.dtype)


def mean_mlp(x, w1, b1, w2, b2):
    """Computes (relu(x @ w1 + b1) @ w2 + b2).mean(axis=0) in one Pallas kernel.

    x:  [S, B, D] float32   (S = sample dim reduced by mean(dim=0))
    w1: [D, H], b1: [1, H]
    w2: [H, O], b2: [1, O]
    returns [B, O] float32
    """
    S, B, D = x.shape
    O = w2.shape[1]

    # Zero-pad to lane/sublane-dense shapes (correctness preserved: padded
    # rows/cols of the weights/biases are zero, so padded outputs are zero
    # and are sliced off below).
    xp = _pad_axis(_pad_axis(x, 2, _LANE), 1, _SUBLANE)
    w1p = _pad_axis(_pad_axis(w1, 0, _LANE), 1, _LANE)
    b1p = _pad_axis(b1, 1, _LANE)
    w2p = _pad_axis(_pad_axis(w2, 0, _LANE), 1, _LANE)
    b2p = _pad_axis(b2, 1, _LANE)

    Bp, Op = xp.shape[1], w2p.shape[1]

    # Grid-free call: every operand fits comfortably in VMEM at these shapes,
    # so place whole arrays in VMEM and invoke the kernel exactly once.
    vmem_spec = pl.BlockSpec(memory_space=pltpu.MemorySpace.VMEM)
    out = pl.pallas_call(
        _mean_mlp_kernel,
        out_shape=jax.ShapeDtypeStruct((Bp, Op), jnp.float32),
        in_specs=[vmem_spec] * 5,
        out_specs=vmem_spec,
    )(xp, w1p, b1p, w2p, b2p)

    return out[:B, :O]


def mean_mlp_reference(x, w1, b1, w2, b2):
    h = jnp.maximum(jnp.einsum("sbd,dh->sbh", x, w1) + b1, 0.0)
    y = jnp.einsum("sbh,ho->sbo", h, w2) + b2
    return y.mean(axis=0)


if __name__ == "__main__":
    # Small shapes consistent with the forward: leading dim S is reduced by mean(dim=0).
    S, B, D, H, O = 4, 8, 16, 32, 16

    key = jax.random.PRNGKey(0)
    kx, kw1, kb1, kw2, kb2 = jax.random.split(key, 5)

    x = jax.random.normal(kx, (S, B, D), dtype=jnp.float32)
    # Deterministic synthetic parameters (PyTorch nn.Linear-like scale).
    w1 = jax.random.normal(kw1, (D, H), dtype=jnp.float32) / jnp.sqrt(D)
    b1 = jax.random.normal(kb1, (1, H), dtype=jnp.float32) * 0.01
    w2 = jax.random.normal(kw2, (H, O), dtype=jnp.float32) / jnp.sqrt(H)
    b2 = jax.random.normal(kb2, (1, O), dtype=jnp.float32) * 0.01

    out = jax.block_until_ready(mean_mlp(x, w1, b1, w2, b2))

    ref = mean_mlp_reference(x, w1, b1, w2, b2)
    assert out.shape == (B, O)
    assert jnp.allclose(out, ref, atol=1e-5, rtol=1e-5), "mismatch vs reference"

    print("KERNEL_OK")
</pallas_src>

<mosaic_0001>
module attributes {stable_mosaic.version = 11 : i64} {
  func.func @_mean_mlp_kernel(%arg0: memref<4x8x128xf32, #tpu.memory_space<vmem>>, %arg1: memref<128x128xf32, #tpu.memory_space<vmem>>, %arg2: memref<1x128xf32, #tpu.memory_space<vmem>>, %arg3: memref<128x128xf32, #tpu.memory_space<vmem>>, %arg4: memref<1x128xf32, #tpu.memory_space<vmem>>, %arg5: memref<8x128xf32, #tpu.memory_space<vmem>>) attributes {dimension_semantics = [], scalar_prefetch = 0 : i64, scratch_operands = 0 : i64, tpu.core_type = #tpu.core_type<tc>} {
    %c0 = arith.constant 0 : index
    %c0_0 = arith.constant 0 : index
    %c0_1 = arith.constant 0 : index
    %0 = vector.load %arg0[%c0, %c0_0, %c0_1] : memref<4x8x128xf32, #tpu.memory_space<vmem>>, vector<4x8x128xf32>
    %1 = vector.shape_cast %0 : vector<4x8x128xf32> to vector<32x128xf32>
    %c0_2 = arith.constant 0 : index
    %c0_3 = arith.constant 0 : index
    %2 = vector.load %arg1[%c0_2, %c0_3] : memref<128x128xf32, #tpu.memory_space<vmem>>, vector<128x128xf32>
    %cst = arith.constant dense<0.000000e+00> : vector<32x128xf32>
    %3 = tpu.matmul %1, %2, %cst {dimension_numbers = #tpu.dot_dimension_numbers<[1], [0], [0], [1], [0, 0, 1, 1], [], []>} : vector<32x128xf32>, vector<128x128xf32>, vector<32x128xf32> -> vector<32x128xf32>
    %c0_4 = arith.constant 0 : index
    %c0_5 = arith.constant 0 : index
    %4 = vector.load %arg2[%c0_4, %c0_5] : memref<1x128xf32, #tpu.memory_space<vmem>>, vector<1x128xf32>
    %5 = vector.broadcast %4 : vector<1x128xf32> to vector<32x128xf32>
    %6 = arith.addf %3, %5 : vector<32x128xf32>
    %cst_6 = arith.constant 0.000000e+00 : f32
    %7 = vector.broadcast %cst_6 : f32 to vector<32x128xf32>
    %8 = arith.maximumf %6, %7 : vector<32x128xf32>
    %9 = vector.shape_cast %8 : vector<32x128xf32> to vector<4x8x128xf32>
    %cst_7 = arith.constant dense<0.000000e+00> : vector<8x128xf32>
    %10 = vector.multi_reduction <add>, %9, %cst_7 [0] : vector<4x8x128xf32> to vector<8x128xf32>
    %cst_8 = arith.constant 2.500000e-01 : f32
    %11 = vector.broadcast %cst_8 : f32 to vector<8x128xf32>
    %12 = arith.mulf %10, %11 : vector<8x128xf32>
    %c0_9 = arith.constant 0 : index
    %c0_10 = arith.constant 0 : index
    %13 = vector.load %arg3[%c0_9, %c0_10] : memref<128x128xf32, #tpu.memory_space<vmem>>, vector<128x128xf32>
    %cst_11 = arith.constant dense<0.000000e+00> : vector<8x128xf32>
    %14 = tpu.matmul %12, %13, %cst_11 {dimension_numbers = #tpu.dot_dimension_numbers<[1], [0], [0], [1], [0, 0, 1, 1], [], []>} : vector<8x128xf32>, vector<128x128xf32>, vector<8x128xf32> -> vector<8x128xf32>
    %c0_12 = arith.constant 0 : index
    %c0_13 = arith.constant 0 : index
    %15 = vector.load %arg4[%c0_12, %c0_13] : memref<1x128xf32, #tpu.memory_space<vmem>>, vector<1x128xf32>
    %16 = vector.broadcast %15 : vector<1x128xf32> to vector<8x128xf32>
    %17 = arith.addf %14, %16 : vector<8x128xf32>
    %c0_14 = arith.constant 0 : index
    %c0_15 = arith.constant 0 : index
    %18 = vector.load %arg5[%c0_14, %c0_15] : memref<8x128xf32, #tpu.memory_space<vmem>>, vector<8x128xf32>
    tpu.vector_store %arg5[%c0_14, %c0_15], %17 {strides = array<i32>} : memref<8x128xf32, #tpu.memory_space<vmem>>, vector<8x128xf32>,
    return
  }
}

</mosaic_0001>

<bundles_post_ra>
// kernel: tpu_custom_call.1
= control target key start
LH: loop header
LB: loop body
LE: loop exit
PB: predicated region body
PF: predicated region fallthrough
CT: control target
= control target key end

     0   :  { %10 = vsyncpa [#allocation3], 0  ;;  %s680_s0 = inlined_call_operand.hbm [shape: f32[4,8,128], index: 0, kind: input, shape index: {}]   ;;  %s681_s1 = inlined_call_operand.hbm [shape: f32[128,128], index: 1, kind: input, shape index: {}]   ;;  %s682_s2 = inlined_call_operand.vmem [shape: f32[1,128], index: 2, kind: input, shape index: {}]   ;;  %s683_s3 = inlined_call_operand.hbm [shape: f32[128,128], index: 3, kind: input, shape index: {}]   ;;  %s684_s4 = inlined_call_operand.vmem [shape: f32[1,128], index: 4, kind: input, shape index: {}]   ;;  %s685_s5 = inlined_call_operand.hbm [shape: f32[8,128], index: 5, kind: output, shape index: {}]  }
   0x1   :  { %11 = vsyncpa [#allocation6], 0 }
   0x2   :  { %12 = vsyncpa [#allocation4], 0  ;;  %s563_s18 = smov [#allocation5]   ;;  %s564_s20 = smov [#allocation2]  }
   0x3   :  { %s30_s19 = sshll.u32 %s563_s18, 4  ;;  %s18_s21 = sshll.u32 %s564_s20, 4  ;;  %s31_s19 = int_to_ptr.vmem [resolvable:$true] %s30_s19  ;;  %s602_s21 = int_to_ptr.vmem [resolvable:$true] %s18_s21 }
   0x4   :  { %s469_s24 = scalar_lea.hbm %s681_s1, 2048 }
   0x5   :  { %p470_p0 = scmp.ne.s32.totalorder %s681_s1, %s469_s24  ;;  %p473_p1 = scmp.lt.u32.totalorder %s469_s24, %s681_s1 }
   0x7   :  { %p475_p2 = pnand %p473_p1, %p470_p0 }
   0x9   :  { %478 = shalt.err (!%p475_p2)
}
   0xa   :  { %s479_s29 = scalar_lea.vmem %s31_s19, 2048  ;;  %p484_p4 = scmp.lt.s32.totalorder %s31_s19, %s31_s19 }
   0xb   :  { %p480_p3 = scmp.ne.s32.totalorder %s31_s19, %s479_s29  ;;  %p485_p5 = scmp.lt.s32.totalorder %s479_s29, %s479_s29 }
   0xd   :  { %p486_p6 = por %p485_p5, %p484_p4 }
   0xf   :  { %p487_p7 = pnand %p486_p6, %p480_p3 }
  0x11   :  { %490 = shalt.err (!%p487_p7)
}
  0x12   :  { %s565_s30 = smov 128   ;;  %s566_s6 = smov 8  }
  0x13   :  { %36 = dma.hbm_to_vmem [thread:$0]  %s681_s1, 2048, %s31_s19, [#allocation6], %s565_s30, %s565_s30, %s566_s6  }
  0x14   :  { %s491_s11 = scalar_lea.hbm %s680_s0, 512 }
  0x15   :  { %p492_p8 = scmp.ne.s32.totalorder %s680_s0, %s491_s11  ;;  %p495_p9 = scmp.lt.u32.totalorder %s491_s11, %s680_s0 }
  0x17   :  { %p497_p10 = pnand %p495_p9, %p492_p8 }
  0x19   :  { %500 = shalt.err (!%p497_p10)
}
  0x1a   :  { %s501_s16 = scalar_lea.vmem %s602_s21, 512  ;;  %p506_p12 = scmp.lt.s32.totalorder %s602_s21, %s602_s21 }
  0x1b   :  { %p502_p11 = scmp.ne.s32.totalorder %s602_s21, %s501_s16  ;;  %p507_p13 = scmp.lt.s32.totalorder %s501_s16, %s501_s16 }
  0x1d   :  { %p508_p0 = por %p507_p13, %p506_p12 }
  0x1f   :  { %p509_p1 = pnand %p508_p0, %p502_p11 }
  0x21   :  { %512 = shalt.err (!%p509_p1)
}
  0x22   :  { %24 = dma.hbm_to_vmem [thread:$0]  %s680_s0, 512, %s602_s21, [#allocation3], %s565_s30, %s565_s30, %s566_s6  }
  0x23   :  { %s567_s18 = smov [#allocation7]   ;;  %s513_s23 = scalar_lea.hbm %s683_s3, 2048 }
  0x24   :  { %s44_s19 = sshll.u32 %s567_s18, 4  ;;  %p514_p2 = scmp.ne.s32.totalorder %s683_s3, %s513_s23  ;;  %s45_s19 = int_to_ptr.vmem [resolvable:$true] %s44_s19 }
  0x25   :  { %p517_p3 = scmp.lt.u32.totalorder %s513_s23, %s683_s3 }
  0x27   :  { %p519_p4 = pnand %p517_p3, %p514_p2 }
  0x29   :  { %522 = shalt.err (!%p519_p4)
}
  0x2a   :  { %s523_s28 = scalar_lea.vmem %s45_s19, 2048  ;;  %p528_p6 = scmp.lt.s32.totalorder %s45_s19, %s45_s19 }
  0x2b   :  { %p524_p5 = scmp.ne.s32.totalorder %s45_s19, %s523_s28  ;;  %p529_p7 = scmp.lt.s32.totalorder %s523_s28, %s523_s28 }
  0x2d   :  { %p530_p8 = por %p529_p7, %p528_p6 }
  0x2f   :  { %p531_p9 = pnand %p530_p8, %p524_p5 }
  0x31   :  { %534 = shalt.err (!%p531_p9)
}
  0x32   :  { %50 = dma.hbm_to_vmem [thread:$0]  %s683_s3, 2048, %s45_s19, [#allocation6], %s565_s30, %s565_s30, %s566_s6  }
  0x33   :  { %557 = dma.done.wait [#allocation3], 512  }
  0x34   :  { %558 = vsyncadd [#allocation3], 4294966784 }
  0x35   :  { %559 = dma.done.wait [#allocation6], 4096  }
  0x36   :  { %560 = vsyncadd [#allocation6], 4294963200  ;;  %v568_v0 = vmov 0.0|0.0   ;;  %v66_v1 = vld [vmem:[#allocation5] sm:$0xff]  ;;  %v67_v2 = vld [vmem:[#allocation5 + $0x8] sm:$0xff]  ;;  %vm569_vm0 = vmmov 0  }
  0x37   :  { %436 = vmatprep.subr.bf16.mxu1 %v568_v0  ;;  %v68_v3 = vld [vmem:[#allocation5 + $0x10] sm:$0xff]  ;;  %v404_v4 = vpack.c.bf16 %v67_v2, %v66_v1  ;;  %v69_v5 = vld [vmem:[#allocation5 + $0x18] sm:$0xff]  ;;  %v70_v7 = vld [vmem:[#allocation5 + $0x20] sm:$0xff]  ;;  %v570_v53 = vmov 0.0  }
  0x38   :  { %v408_v6 = vpack.c.bf16 %v69_v5, %v68_v3  ;;  %v71_v8 = vld [vmem:[#allocation5 + $0x28] sm:$0xff]  ;;  %v62_v10 = vld [vmem:[#allocation2] sm:$0xff]  ;;  %v72_v11 = vld [vmem:[#allocation5 + $0x30] sm:$0xff]  ;;  %401 = vmatprep.mubr.msk.f32.mxu1 %vm569_vm0, %v570_v53 }
  0x39   :  { %405 = vmatprep.subr.bf16.mxu0 %v404_v4  ;;  %v412_v9 = vpack.c.bf16 %v71_v8, %v70_v7  ;;  %v73_v12 = vld [vmem:[#allocation5 + $0x38] sm:$0xff]  ;;  %363 = vmatprep.mubr.f32.mxu0 %v62_v10  ;;  %v182_v13 = vld [vmem:[#allocation7] sm:$0xff]  ;;  %v183_v14 = vld [vmem:[#allocation7 + $0x8] sm:$0xff] }
  0x3a   :  { %407 = vmatpush3.bf16.msra.mxu0 %v404_v4  ;;  %v184_v15 = vld [vmem:[#allocation7 + $0x10] sm:$0xff]  ;;  %v185_v16 = vld [vmem:[#allocation7 + $0x18] sm:$0xff]  ;;  %v437_v17 = vpack.c.bf16 %v183_v14, %v182_v13  ;;  %v416_v18 = vpack.c.bf16 %v73_v12, %v72_v11  ;;  %v74_v19 = vld [vmem:[#allocation5 + $0x40] sm:$0xff] }
  0x3b   :  { %409 = vmatprep.subr.bf16.mxu0 %v408_v6  ;;  %v75_v20 = vld [vmem:[#allocation5 + $0x48] sm:$0xff]  ;;  %v440_v21 = vpack.c.bf16 %v185_v16, %v184_v15  ;;  %v186_v22 = vld [vmem:[#allocation7 + $0x20] sm:$0xff]  ;;  %v76_v25 = vld [vmem:[#allocation5 + $0x50] sm:$0xff] }
  0x3c   :  { %438 = vmatpush3.bf16.msra.mxu1 %v437_v17  ;;  %v187_v23 = vld [vmem:[#allocation7 + $0x28] sm:$0xff]  ;;  %v420_v24 = vpack.c.bf16 %v75_v20, %v74_v19  ;;  %v77_v26 = vld [vmem:[#allocation5 + $0x58] sm:$0xff]  ;;  %v188_v28 = vld [vmem:[#allocation7 + $0x30] sm:$0xff] }
  0x3d   :  { %439 = vmatprep.subr.bf16.mxu1 %v568_v0  ;;  %v443_v27 = vpack.c.bf16 %v187_v23, %v186_v22  ;;  %v189_v29 = vld [vmem:[#allocation7 + $0x38] sm:$0xff]  ;;  %v424_v30 = vpack.c.bf16 %v77_v26, %v76_v25  ;;  %v78_v31 = vld [vmem:[#allocation5 + $0x60] sm:$0xff]  ;;  %v79_v32 = vld [vmem:[#allocation5 + $0x68] sm:$0xff] }
  0x3e   :  { %411 = vmatpush3.bf16.msra.mxu0 %v408_v6  ;;  %v446_v33 = vpack.c.bf16 %v189_v29, %v188_v28  ;;  %v428_v34 = vpack.c.bf16 %v79_v32, %v78_v31  ;;  %v80_v35 = vld [vmem:[#allocation5 + $0x70] sm:$0xff]  ;;  %v81_v36 = vld [vmem:[#allocation5 + $0x78] sm:$0xff]  ;;  %v63_v38 = vld [vmem:[#allocation2 + $0x8] sm:$0xff] }
  0x3f   :  { %413 = vmatprep.subr.bf16.mxu0 %v412_v9  ;;  %v432_v37 = vpack.c.bf16 %v81_v36, %v80_v35  ;;  %v64_v39 = vld [vmem:[#allocation2 + $0x10] sm:$0xff]  ;;  %v65_v40 = vld [vmem:[#allocation2 + $0x18] sm:$0xff]  ;;  %v190_v41 = vld [vmem:[#allocation7 + $0x40] sm:$0xff] }
  0x40   :  { %441 = vmatpush3.bf16.msra.mxu1 %v440_v21  ;;  %v191_v42 = vld [vmem:[#allocation7 + $0x48] sm:$0xff]  ;;  %v192_v44 = vld [vmem:[#allocation7 + $0x50] sm:$0xff]  ;;  %v193_v45 = vld [vmem:[#allocation7 + $0x58] sm:$0xff] }
  0x41   :  { %442 = vmatprep.subr.bf16.mxu1 %v568_v0  ;;  %v449_v43 = vpack.c.bf16 %v191_v42, %v190_v41  ;;  %v452_v46 = vpack.c.bf16 %v193_v45, %v192_v44  ;;  %v194_v47 = vld [vmem:[#allocation7 + $0x60] sm:$0xff]  ;;  %v195_v48 = vld [vmem:[#allocation7 + $0x68] sm:$0xff]  ;;  %v196_v50 = vld [vmem:[#allocation7 + $0x70] sm:$0xff] }
  0x42   :  { %415 = vmatpush3.bf16.msra.mxu0 %v412_v9  ;;  %v455_v49 = vpack.c.bf16 %v195_v48, %v194_v47  ;;  %v197_v51 = vld [vmem:[#allocation7 + $0x78] sm:$0xff]  ;;  %v292_v54 = vld [vmem:[%s682_s2] ss:$0 sm:$0xff]  ;;  %s571_s2 = smov [#allocation8]  }
  0x43   :  { %417 = vmatprep.subr.bf16.mxu0 %v416_v18  ;;  %v458_v52 = vpack.c.bf16 %v197_v51, %v196_v50  ;;  %v293_v7 = vld [vmem:[%s684_s4] ss:$0 sm:$0xff]  ;;  %s282_s7 = sshll.u32 %s571_s2, 4  ;;  %s283_s7 = int_to_ptr.vmem [resolvable:$true] %s282_s7 }
  0x44   :  { %444 = vmatpush3.bf16.msra.mxu1 %v443_v27  ;;  %s535_s8 = scalar_lea.vmem %s283_s7, 128  ;;  %p540_p11 = scmp.lt.s32.totalorder %s283_s7, %s283_s7 }
  0x45   :  { %445 = vmatprep.subr.bf16.mxu1 %v568_v0  ;;  %p536_p10 = scmp.ne.s32.totalorder %s283_s7, %s535_s8  ;;  %p541_p12 = scmp.lt.s32.totalorder %s535_s8, %s535_s8 }
  0x46   :  { %419 = vmatpush3.bf16.msra.mxu0 %v416_v18 }
  0x47   :  { %421 = vmatprep.subr.bf16.mxu0 %v420_v24  ;;  %p542_p13 = por %p541_p12, %p540_p11 }
  0x48   :  { %447 = vmatpush3.bf16.msra.mxu1 %v446_v33 }
  0x49   :  { %448 = vmatprep.subr.bf16.mxu1 %v568_v0  ;;  %p543_p0 = pnand %p542_p13, %p536_p10 }
  0x4a   :  { %423 = vmatpush3.bf16.msra.mxu0 %v420_v24 }
  0x4b   :  { %425 = vmatprep.subr.bf16.mxu0 %v424_v30 }
  0x4c   :  { %450 = vmatpush3.bf16.msra.mxu1 %v449_v43 }
  0x4d   :  { %451 = vmatprep.subr.bf16.mxu1 %v568_v0 }
  0x4e   :  { %427 = vmatpush3.bf16.msra.mxu0 %v424_v30 }
  0x4f   :  { %429 = vmatprep.subr.bf16.mxu0 %v428_v34 }
  0x50   :  { %453 = vmatpush3.bf16.msra.mxu1 %v452_v46 }
  0x51   :  { %454 = vmatprep.subr.bf16.mxu1 %v568_v0 }
  0x52   :  { %431 = vmatpush3.bf16.msra.mxu0 %v428_v34 }
  0x53   :  { %433 = vmatprep.subr.bf16.mxu0 %v432_v37 }
  0x54   :  { %456 = vmatpush3.bf16.msra.mxu1 %v455_v49 }
  0x55   :  { %457 = vmatprep.subr.bf16.mxu1 %v568_v0 }
  0x56   :  { %435 = vmatpush3.bf16.msra.mxu0 %v432_v37 }
  0x58   :  { %459 = vmatpush3.bf16.msra.mxu1 %v458_v52 }
  0x59   :  { %364 = vmatmul.mubr.f32.vlgmr.msra.gmra.mrb[0].mxu0 %v63_v38 }
  0x5a   :  { %366 = vmatprep.mubr.f32.mxu0 %v64_v39 }
  0x5d   :  { %367 = vmatmul.mubr.f32.gmra.mrb[2].mxu0 %v65_v40 }
 0x12c   :  { %v365_v55 = vpop.f32.mrb[0].mxu0 }
 0x12d   :  { %v161_v56 = vadd.f32 %v365_v55, %v292_v54  ;;  %v155_v57 = vpop.f32.mrb[1].mxu0 }
 0x12e   :  { %v156_v58 = vadd.f32 %v292_v54, %v155_v57 }
 0x12f   :  { %v175_v59 = vmax.f32 %v161_v56, 0.0 }
 0x130   :  { %v174_v60 = vmax.f32 %v156_v58, 0.0  ;;  %v368_v61 = vpop.f32.mrb[2].mxu0 }
 0x131   :  { %v165_v62 = vpop.f32.mrb[3].mxu0  ;;  %v171_v0 = vadd.f32 %v368_v61, %v292_v54 }
 0x132   :  { %v178_v63 = vadd.f32 %v175_v59, %v174_v60  ;;  %v166_v1 = vadd.f32 %v292_v54, %v165_v62 }
 0x133   :  { %v177_v3 = vmax.f32 %v171_v0, 0.0 }
 0x134   :  { %v176_v2 = vmax.f32 %v166_v1, 0.0 }
 0x136   :  { %v179_v4 = vadd.f32 %v178_v63, %v176_v2 }
 0x138   :  { %v180_v5 = vadd.f32 %v179_v4, %v177_v3 }
 0x13a   :  { %v181_v6 = vmul.f32 0.25, %v180_v5 }
 0x13c   :  { %402 = vmatmul.mubr.f32.vlgmr.msra.gmra.mrb[0].mxu1 %v181_v6 }
 0x20f   :  { %v271_v8 = vpop.f32.mrb[0].mxu1 }
 0x210   :  { %v272_v9 = vadd.f32 %v293_v7, %v271_v8  ;;  %v403_v10 = vpop.f32.mrb[1].mxu1 }
 0x212   :  { %275 = vst [vmem:[#allocation8] sm:$0xff] %v272_v9 }
 0x213   :  { %546 = shalt.err (!%p543_p0)
}
 0x214   :  { %s547_s11 = scalar_lea.hbm %s685_s5, 128 }
 0x215   :  { %p548_p1 = scmp.ne.s32.totalorder %s685_s5, %s547_s11  ;;  %p551_p2 = scmp.lt.u32.totalorder %s547_s11, %s685_s5 }
 0x217   :  { %p553_p3 = pnand %p551_p2, %p548_p1 }
 0x219   :  { %556 = shalt.err (!%p553_p3)
}
 0x21a   :  { %285 = dma.vmem_to_hbm [thread:$0]  %s283_s7, 128, %s685_s5, [#allocation4]  }
 0x21b   :  { %561 = dma.done.wait [#allocation4], 128  }
 0x21c   :  { %562 = vsyncadd [#allocation4], 4294967168 }
 0x21d   :  { %289 = vsyncpa [#allocation3], 1 }
 0x21e   :  { %290 = vsyncpa [#allocation6], 1 }
 0x21f   :  { %291 = vsyncpa [#allocation4], 1 }

</bundles_post_ra>
